<compile_context>
chip_gen: v7x
topology: tpu7x:2x2x1
jax: 0.10.0
libtpu: 0.0.40
codegen_flags: <defaults>
</compile_context>

<pallas_src>
import functools
import math

import jax
import jax.numpy as jnp
from jax.experimental import pallas as pl
from jax.experimental.pallas import tpu as pltpu


# ---------------------------------------------------------------------------
# Parameter / buffer setup (plain JAX glue): the sin/cos positional table.
# ---------------------------------------------------------------------------
def make_pe_table(d_model: int, max_len: int, dtype=jnp.float32) -> jnp.ndarray:
    """Returns pe with shape (max_len, 1, d_model), matching the torch buffer."""
    position = jnp.arange(0, max_len, dtype=jnp.float32)[:, None]             # (L, 1)
    div_term = jnp.exp(
        jnp.arange(0, d_model, 2, dtype=jnp.float32) * (-math.log(10000.0) / d_model)
    )                                                                          # (D/2,)
    angles = position * div_term                                               # (L, D/2)
    pe = jnp.zeros((max_len, d_model), dtype=jnp.float32)
    pe = pe.at[:, 0::2].set(jnp.sin(angles))
    pe = pe.at[:, 1::2].set(jnp.cos(angles))
    # torch: pe.unsqueeze(0).transpose(0, 1) -> (max_len, 1, d_model)
    return pe[:, None, :].astype(dtype)


# ---------------------------------------------------------------------------
# Pallas kernel: o = x * scale + pe  (pe broadcast over the batch axis).
# All arithmetic in f32; single downcast on the store.
# ---------------------------------------------------------------------------
def _scaled_add_pe_kernel(x_ref, pe_ref, o_ref, *, scale: float):
    # x_ref: (tile_s, B, D); pe_ref: (tile_s, 1, D) -> broadcast over batch
    # (a cheap sublane broadcast; hidden under the HBM DMA).
    x = x_ref[...].astype(jnp.float32)
    pe = pe_ref[...].astype(jnp.float32)
    if scale != 1.0:
        x = x * jnp.float32(scale)
    o_ref[...] = (x + pe).astype(o_ref.dtype)


def _choose_tile_s(S: int, B: int, D: int, itemsize: int,
                   target_block_bytes: int = 4 * 1024 * 1024) -> int:
    """Pick a seq-tile so each x/o block is ~4 MiB (best measured HBM-roofline
    fraction for elementwise streaming), while keeping at least 4 grid steps
    (>= 2 per v7x TensorCore) so DMA and compute pipeline, and preferring a
    tile that divides S evenly so neither TC gets a padded remainder block."""
    rows = max(1, target_block_bytes // max(1, B * D * itemsize))
    # >= 4 steps when S permits (2 per TC on v7x keeps double-buffering alive).
    rows = min(rows, max(1, -(-S // 4)))
    tile_s = max(1, min(S, int(rows)))
    # Prefer even divisibility, but don't shrink the block by more than ~2x.
    if S % tile_s != 0:
        d = tile_s
        while d > max(1, tile_s // 2):
            if S % d == 0:
                tile_s = d
                break
            d -= 1
    return tile_s


def positional_encoding_forward(x: jnp.ndarray, pe: jnp.ndarray,
                                *, scale: float = 1.0) -> jnp.ndarray:
    """x: (S, B, D);  pe: (max_len, 1, D).  Returns x * scale + pe[:S]."""
    S, B, D = x.shape
    max_len = pe.shape[0]
    assert S <= max_len, (
        f"sequence length {S} exceeds positional table max_len {max_len}")
    assert pe.shape[1] == 1 and pe.shape[2] == D, "pe must be (max_len, 1, d_model)"

    itemsize = jnp.dtype(x.dtype).itemsize
    tile_s = _choose_tile_s(S, B, D, itemsize)
    num_steps = pl.cdiv(S, tile_s)

    kernel = functools.partial(_scaled_add_pe_kernel, scale=float(scale))

    # Advisory cost hint: purely HBM-bandwidth-bound, negligible flops.
    cost = pl.CostEstimate(
        flops=2 * S * B * D,
        transcendentals=0,
        bytes_accessed=2 * S * B * D * itemsize + S * D * jnp.dtype(pe.dtype).itemsize,
    )

    def build_call(buffer_depth):
        x_spec_kwargs = {}
        if buffer_depth is not None:
            # Deeper input pipelining hides DMA jitter on v7x's faster HBM.
            x_spec_kwargs["pipeline_mode"] = pl.Buffered(buffer_depth)
        in_specs = [
            pl.BlockSpec((tile_s, B, D), lambda i: (i, 0, 0), **x_spec_kwargs),
            # Full pe buffer is passed; only the first S rows are ever touched
            # by this index_map, and the f32 -> x.dtype cast happens in-kernel.
            pl.BlockSpec((tile_s, 1, D), lambda i: (i, 0, 0)),
        ]
        return pl.pallas_call(
            kernel,
            out_shape=jax.ShapeDtypeStruct((S, B, D), x.dtype),
            grid=(num_steps,),
            in_specs=in_specs,
            out_specs=pl.BlockSpec((tile_s, B, D), lambda i: (i, 0, 0)),
            # Elementwise, identical tiling/shape/dtype: reuse x's HBM buffer.
            input_output_aliases={0: 0},
            cost_estimate=cost,
            compiler_params=pltpu.CompilerParams(
                # seq tiles shard across TCs on v7x; harmless no-op on v5e/v6e.
                dimension_semantics=("parallel",),
                # 4 MiB blocks double-buffered would trip v5e's 16 MiB scoped
                # default; raise it explicitly (physical VMEM is far larger).
                vmem_limit_bytes=32 << 20,
            ),
        )

    buffer_depth = 3 if num_steps >= 3 else None
    try:
        out = build_call(buffer_depth)(x, pe)
    except Exception:
        if buffer_depth is None:
            raise
        # Fallback: default double-buffering if Buffered(3) is rejected.
        out = build_call(None)(x, pe)

    # TODO(synk): training-mode nn.Dropout(p=0.1) (mask + 1/(1-p) scaling) is not
    # reproduced; eval-mode semantics (identity) are used. If needed it can be
    # fused here with pltpu.prng_seed + pltpu.prng_random_bits and a
    # pl.reciprocal(1-p) scale, avoiding a second HBM pass.
    return out


if __name__ == "__main__":
    # Small shapes consistent with the module's forward (S, B, d_model).
    # d_model is a multiple of 128 (lane-dense stores); batch is a multiple of
    # 8 (full f32 sublanes; use a multiple of 16 for bf16 activations).
    seq_len, batch, d_model = 16, 8, 256
    max_len = 64
    scale = math.sqrt(d_model)  # the model applies emb * sqrt(d_model) before PE

    key = jax.random.PRNGKey(0)
    x = jax.random.normal(key, (seq_len, batch, d_model), dtype=jnp.float32)
    pe = make_pe_table(d_model, max_len)

    # Reference (pure JAX) computed before the kernel call (the output may
    # alias/donate x's buffer).
    y_ref = x * jnp.float32(scale) + pe[:seq_len].astype(x.dtype)

    y = positional_encoding_forward(x, pe, scale=scale)
    jax.block_until_ready(y)

    assert y.shape == (seq_len, batch, d_model)
    assert jnp.allclose(y, y_ref, atol=1e-5, rtol=1e-5), "kernel mismatch vs reference"

    print("KERNEL_OK")
</pallas_src>

<mosaic_0001>
module attributes {stable_mosaic.version = 11 : i64} {
  func.func @_scaled_add_pe_kernel(%arg0: i32, %arg1: memref<4x8x256xf32, #tpu.memory_space<vmem>>, %arg2: memref<4x1x256xf32, #tpu.memory_space<vmem>>, %arg3: memref<4x8x256xf32, #tpu.memory_space<vmem>>) attributes {dimension_semantics = [#tpu.dimension_semantics<parallel>], iteration_bounds = array<i64: 4>, scalar_prefetch = 0 : i64, scratch_operands = 0 : i64, tpu.core_type = #tpu.core_type<tc>, window_params = [{transform_indices = @transform_0, window_bounds = array<i64: 4, 8, 256>}, {transform_indices = @transform_1, window_bounds = array<i64: 4, 1, 256>}, {transform_indices = @transform_2, window_bounds = array<i64: 4, 8, 256>}]} {
    %c0 = arith.constant 0 : index
    %c0_0 = arith.constant 0 : index
    %c0_1 = arith.constant 0 : index
    %0 = vector.load %arg1[%c0, %c0_0, %c0_1] : memref<4x8x256xf32, #tpu.memory_space<vmem>>, vector<4x8x256xf32>
    %c0_2 = arith.constant 0 : index
    %c0_3 = arith.constant 0 : index
    %c0_4 = arith.constant 0 : index
    %1 = vector.load %arg2[%c0_2, %c0_3, %c0_4] : memref<4x1x256xf32, #tpu.memory_space<vmem>>, vector<4x1x256xf32>
    %cst = arith.constant 1.600000e+01 : f32
    %2 = vector.broadcast %cst : f32 to vector<4x8x256xf32>
    %3 = arith.mulf %0, %2 : vector<4x8x256xf32>
    %4 = vector.broadcast %1 : vector<4x1x256xf32> to vector<4x8x256xf32>
    %5 = arith.addf %3, %4 : vector<4x8x256xf32>
    %c0_5 = arith.constant 0 : index
    %c0_6 = arith.constant 0 : index
    %c0_7 = arith.constant 0 : index
    %6 = vector.load %arg3[%c0_5, %c0_6, %c0_7] : memref<4x8x256xf32, #tpu.memory_space<vmem>>, vector<4x8x256xf32>
    tpu.vector_store %arg3[%c0_5, %c0_6, %c0_7], %5 {strides = array<i32>} : memref<4x8x256xf32, #tpu.memory_space<vmem>>, vector<4x8x256xf32>,
    return
  }
  func.func @transform_0(%arg0: i32) -> (i32, i32, i32) {
    %c0_i32 = arith.constant 0 : i32
    %c0_i32_0 = arith.constant 0 : i32
    %c0_i32_1 = arith.constant 0 : i32
    return %arg0, %c0_i32, %c0_i32_0 : i32, i32, i32
  }
  func.func @transform_1(%arg0: i32) -> (i32, i32, i32) {
    %c0_i32 = arith.constant 0 : i32
    %c0_i32_0 = arith.constant 0 : i32
    %c0_i32_1 = arith.constant 0 : i32
    return %arg0, %c0_i32, %c0_i32_0 : i32, i32, i32
  }
  func.func @transform_2(%arg0: i32) -> (i32, i32, i32) {
    %c0_i32 = arith.constant 0 : i32
    %c0_i32_0 = arith.constant 0 : i32
    %c0_i32_1 = arith.constant 0 : i32
    return %arg0, %c0_i32, %c0_i32_0 : i32, i32, i32
  }
}

</mosaic_0001>

<bundles_post_ra>
// kernel: tpu_custom_call.1
= control target key start
LH: loop header
LB: loop body
LE: loop exit
PB: predicated region body
PF: predicated region fallthrough
CT: control target
= control target key end

     0   :  { %7 = vsyncpa [#allocation3], 0  ;;  %s747_s0 = inlined_call_operand.hbm [shape: f32[16,8,256], index: 0, kind: input, shape index: {}, may-alias: {0,2}]   ;;  %s748_s1 = inlined_call_operand.vmem [shape: f32[64,1,256], index: 1, kind: input, shape index: {}]   ;;  %s749_s2 = inlined_call_operand.hbm [shape: f32[16,8,256], index: 2, kind: output, shape index: {}, may-alias: {0,2}]  }
   0x1   :  { %9 = vsyncpa [#allocation3 + $0x1], 0 }
   0x2   :  { %10 = vsyncpa [#allocation4], 0 }
   0x3   :  { %12 = vsyncpa [#allocation4 + $0x1], 0  ;;  %s558_s9 = smov 0   ;;  %s560_s10 = smov 0  }
   0x4   :  { %s562_s11 = smov 0   ;;  %s564_s12 = smov 0  }
   0x5 LB: > { %s579_s13 = sadd.s32 4294967295, %s535_s12   ;;  %s367_s14 = sadd.s32 4294967294, %s535_s12   ;;  %s535_s12 = sphi %s564_s12, %s761_s12   ;;  %s531_s11 = sphi %s562_s11, %s760_s11   ;;  %s527_s10 = sphi %s560_s10, %s759_s10   ;;  %s523_s9 = sphi %s558_s9, %s758_s9  }
   0x6   : > { %s583_s15 = sadd.s32 1, %s535_s12   ;;  %s25_s16 = sadd.s32 1, %s531_s11 }
   0x7   : > { %s22_s17 = ssub.s32 %s535_s12, %s583_s15  ;;  %p32_p0 = scmp.ne.s32.totalorder %s531_s11, %s527_s10 }
   0x8   : > { %p23_p1 = scmp.eq.s32.totalorder %s22_s17, 0  ;;  %p33_p2 = scmp.eq.s32.totalorder %s535_s12, 0 }
   0x9   : > { %p38_p3 = scmp.ne.s32.totalorder %s527_s10, %s523_s9  ;;  %p39_p4 = scmp.eq.s32.totalorder %s579_s13, 0 }
   0xa   : > { %s595_s18 = scalar_select %p23_p1, %s531_s11, %s25_s16  }
   0xb   : > { %p597_p5 = por %p33_p2, %p32_p0  ;;  %p601_p6 = por %p39_p4, %p38_p3 }
   0xc   : > { %p88_p7 = scmp.eq.s32.totalorder %s579_s13, 3  ;;  %p94_p8 = scmp.eq.s32.totalorder %s367_s14, 3 }
   0xd   : > { %p401_p9 = scmp.lt.s32.totalorder %s535_s12, 4  ;;  %s114_s23 = sand.u32 1, %s531_s11  }
   0xe   : > { %p607_p10 = por %p88_p7, %p32_p0  ;;  %p611_p11 = por %p94_p8, %p38_p3 }
   0xf   : > { %s386_s24 = sshll.u32 %s535_s12, 10  ;;  %s370_s25 = sshll.u32 %s114_s23, 6 }
  0x10   : > { %s753_s21 = scalar_select %p607_p10, 1, 0 }
  0x11   : > { %s754_s22 = scalar_select %p611_p11, 1, 0 }
  0x12   : > { %s620_s28 = scalar_lea.hbm %s747_s0, %s386_s24  ;;  %s118_s29 = scalar_lea.vmem [#allocation2], %s370_s25 }
  0x13   : > { %s126_s30 = sshll.u32 %s118_s29, 4  ;;  %p624_p12 = pnand %p401_p9, %p597_p5  ;;  %s628_s30 = int_to_ptr.vmem [resolvable:$true] %s126_s30 }
  0x14   : > { %s630_s4 = scalar_lea.sflag [#allocation3], %s114_s23  ;;  %s439_s5 = scalar_lea.hbm %s620_s28, 1024 }
  0x15   : > { %p440_p13 = scmp.ne.s32.totalorder %s620_s28, %s439_s5  ;;  %p441_p0 = pneg %p624_p12 }
  0x16   : > { %s444_s8 = scalar_lea.hbm %s747_s0, 4096  ;;  %p445_p3 = scmp.lt.u32.totalorder %s620_s28, %s747_s0 }
  0x17   : > { %p442_p1 = pnand %p441_p0, %p440_p13  ;;  %p446_p4 = scmp.lt.u32.totalorder %s444_s8, %s439_s5 }
  0x18   : > { %p448_p7 = scmp.lt.u32.totalorder %s439_s5, %s620_s28 }
  0x19   : > { %p443_p2 = pneg %p442_p1  ;;  %p447_p5 = por %p446_p4, %p445_p3 }
  0x1b   : > { %p449_p8 = por %p448_p7, %p447_p5 }
  0x1d   : > { %p450_p9 = pnand %p449_p8, %p443_p2 }
  0x1f   : > { %453 = shalt.err (!%p450_p9)
}
  0x20   : > { %s454_s17 = scalar_lea.vmem %s628_s30, 1024  ;;  %s537_s19 = smov [#allocation2]  }
  0x21   : > { %p455_p13 = scmp.ne.s32.totalorder %s628_s30, %s454_s17  ;;  %s459_s23 = sshll.u32 %s537_s19, 4  ;;  %s460_s23 = int_to_ptr.vmem [resolvable:$false] %s459_s23 }
  0x22   : > { %s461_s24 = scalar_lea.vmem %s460_s23, 2048  ;;  %p462_p10 = scmp.lt.s32.totalorder %s628_s30, %s460_s23 }
  0x23   : > { %p457_p1 = pnand %p455_p13, %p441_p0  ;;  %p463_p3 = scmp.lt.s32.totalorder %s461_s24, %s454_s17 }
  0x25   : > { %p458_p11 = pneg %p457_p1  ;;  %p464_p4 = por %p463_p3, %p462_p10 }
  0x27   : > { %p465_p5 = pnand %p464_p4, %p458_p11 }
  0x29   : > { %468 = shalt.err (!%p465_p5)
}
  0x2a   : > { %s538_s25 = smov 256   ;;  %s539_s26 = smov 16  }
  0x2b   : > { %396 = dma.hbm_to_vmem [thread:$0]  (!%p624_p12), %s620_s28, 1024, %s628_s30, %s630_s4, %s538_s25, %s538_s25, %s539_s26  }
  0x2c   : > { %p374_p0 = scmp.ge.s32.totalorder %s535_s12, 1  ;;  %p143_p2 = scmp.lt.s32.totalorder %s535_s12, 5 }
  0x2e   : > { %p144_p7 = pnand %p374_p0, %p143_p2 }
  0x2f   : > { %s661_s27 = sand.u32 (!%p144_p7), 1, %s527_s10  }
  0x30   : > { %147 = sbr.rel (%p144_p7) target bundleno = 87 (0x57), region = 28  ;;  %s375_s29 = sshll.u32 (!%p144_p7), %s661_s27, 6 }
  0x31   : > { %s150_s5 = scalar_lea.sflag (!%p144_p7), [#allocation3], %s661_s27  ;;  %s667_s6 = scalar_lea.vmem (!%p144_p7), [#allocation2], %s375_s29 }
  0x37   : > { %514 = dma.done.wait (%p601_p6), %s150_s5, 1024  }
  0x38   : > { %516 = vsyncadd (%p601_p6), %s150_s5, 4294966272  ;;  %s377_s28 = sshll.u32 %s579_s13, 2  ;;  %v211_v0 = vlaneseq  ;;  %v187_v4 = vld [vmem:[%s667_s6] sm:$0xff]  ;;  %v188_v6 = vld [vmem:[%s667_s6 + $0x8] sm:$0xff]  ;;  %s685_s20 = scalar_lea.vmem [#allocation5], %s375_s29 }
  0x39   : > { %p181_p10 = scmp.lt.s32.totalorder %s377_s28, 63  ;;  %v199_v7 = vmul.f32 16.0, %v187_v4  ;;  %v200_v9 = vmul.f32 16.0, %v188_v6  ;;  %v189_v11 = vld [vmem:[%s667_s6 + $0x10] sm:$0xff]  ;;  %v190_v13 = vld [vmem:[%s667_s6 + $0x18] sm:$0xff]  ;;  %v191_v18 = vld [vmem:[%s667_s6 + $0x20] sm:$0xff] }
  0x3a   : > { %v212_v1 = vshrl.u32 %v211_v0, 7  ;;  %v201_v14 = vmul.f32 16.0, %v189_v11  ;;  %v202_v16 = vmul.f32 16.0, %v190_v13  ;;  %v192_v20 = vld [vmem:[%s667_s6 + $0x28] sm:$0xff]  ;;  %s282_s8 = sshll.u32 %s685_s20, 4  ;;  %v203_v23 = vmul.f32 16.0, %v191_v18  ;;  %s693_s8 = int_to_ptr.vmem [resolvable:$true] %s282_s8 }
  0x3b   : > { %s763_s28 = smov (!%p181_p10, %s377_s28), 63  ;;  %v193_v25 = vld [vmem:[%s667_s6 + $0x30] sm:$0xff]  ;;  %v194_v27 = vld [vmem:[%s667_s6 + $0x38] sm:$0xff]  ;;  %v204_v30 = vmul.f32 16.0, %v192_v20  ;;  %s388_s14 = sshll.u32 %s579_s13, 10 }
  0x3c   : > { %v213_v2 = vsub.s32 0, %v212_v1  ;;  %v217_v3 = vsub.s32 1, %v212_v1  ;;  %s378_s30 = sshll.u32 %s763_s28, 1  ;;  %v205_v33 = vmul.f32 16.0, %v193_v25  ;;  %v206_v35 = vmul.f32 16.0, %v194_v27  ;;  %s702_s19 = scalar_lea.hbm %s749_s2, %s388_s14 }
  0x3d   : > { %s184_s7 = scalar_lea.vmem %s748_s1, %s378_s30  ;;  %s268_s13 = scalar_lea.sflag [#allocation4], %s661_s27 }
  0x3e   : > { %v195_v5 = vld [vmem:[%s184_s7] sm:$0x3]  ;;  %v196_v12 = vld [vmem:[%s184_s7 + $0x2] sm:$0x3]  ;;  %v197_v19 = vld [vmem:[%s184_s7 + $0x4] sm:$0x3] }
  0x3f   : > { %v214_v8 = vrot.slane %v195_v5, %v213_v2  ;;  %v218_v10 = vrot.slane %v195_v5, %v217_v3  ;;  %v222_v15 = vrot.slane %v196_v12, %v213_v2  ;;  %v226_v17 = vrot.slane %v196_v12, %v217_v3  ;;  %v198_v26 = vld [vmem:[%s184_s7 + $0x6] sm:$0x3]  ;;  %s469_s23 = scalar_lea.vmem %s693_s8, 1024  ;;  %p756_p11 = scmp.ne.s32.totalorder %s753_s21, 0 }
  0x40   : > { %v230_v24 = vrot.slane %v197_v19, %v213_v2  ;;  %v234_v31 = vrot.slane %v197_v19, %v217_v3  ;;  %v238_v34 = vrot.slane %v198_v26, %v213_v2  ;;  %v242_v37 = vrot.slane %v198_v26, %v217_v3  ;;  %p470_p6 = scmp.ne.s32.totalorder %s693_s8, %s469_s23  ;;  %s540_s24 = smov [#allocation5]  }
  0x41   : > { %v251_v21 = vadd.f32 %v214_v8, %v199_v7  ;;  %v252_v22 = vadd.f32 %v218_v10, %v200_v9  ;;  %v253_v28 = vadd.f32 %v222_v15, %v201_v14  ;;  %v254_v29 = vadd.f32 %v226_v17, %v202_v16  ;;  %s473_s25 = sshll.u32 %s540_s24, 4  ;;  %s474_s25 = int_to_ptr.vmem [resolvable:$false] %s473_s25 }
  0x42   : > { %v255_v32 = vadd.f32 %v230_v24, %v203_v23  ;;  %v256_v36 = vadd.f32 %v234_v31, %v204_v30  ;;  %v257_v38 = vadd.f32 %v238_v34, %v205_v33  ;;  %v258_v39 = vadd.f32 %v242_v37, %v206_v35  ;;  %p471_p12 = pnand %p470_p6, %p756_p11  ;;  %s475_s26 = scalar_lea.vmem %s474_s25, 2048 }
  0x43   : > { %259 = vst [vmem:[%s685_s20] sm:$0xff] %v251_v21  ;;  %260 = vst [vmem:[%s685_s20 + $0x8] sm:$0xff] %v252_v22  ;;  %p476_p9 = scmp.lt.s32.totalorder %s693_s8, %s474_s25  ;;  %p477_p13 = scmp.lt.s32.totalorder %s475_s26, %s469_s23 }
  0x44   : > { %261 = vst [vmem:[%s685_s20 + $0x10] sm:$0xff] %v253_v28  ;;  %262 = vst [vmem:[%s685_s20 + $0x18] sm:$0xff] %v254_v29  ;;  %p472_p8 = pneg %p471_p12 }
  0x45   : > { %263 = vst [vmem:[%s685_s20 + $0x20] sm:$0xff] %v255_v32  ;;  %264 = vst [vmem:[%s685_s20 + $0x28] sm:$0xff] %v256_v36  ;;  %p478_p1 = por %p477_p13, %p476_p9 }
  0x46   : > { %265 = vst [vmem:[%s685_s20 + $0x30] sm:$0xff] %v257_v38  ;;  %266 = vst [vmem:[%s685_s20 + $0x38] sm:$0xff] %v258_v39 }
  0x47   : > { %p479_p3 = pnand %p478_p1, %p472_p8 }
  0x49   : > { %482 = shalt.err (!%p479_p3)
}
  0x4a   : > { %s483_s29 = scalar_lea.hbm %s702_s19, 1024  ;;  %s487_s28 = scalar_lea.hbm %s749_s2, 4096 }
  0x4b   : > { %p484_p4 = scmp.ne.s32.totalorder %s702_s19, %s483_s29  ;;  %p488_p2 = scmp.lt.u32.totalorder %s702_s19, %s749_s2 }
  0x4c   : > { %p489_p7 = scmp.lt.u32.totalorder %s487_s28, %s483_s29  ;;  %p491_p6 = scmp.lt.u32.totalorder %s483_s29, %s702_s19 }
  0x4d   : > { %p485_p5 = pnand %p484_p4, %p756_p11 }
  0x4e   : > { %p490_p10 = por %p489_p7, %p488_p2 }
  0x4f   : > { %p486_p0 = pneg %p485_p5 }
  0x50   : > { %p492_p12 = por %p491_p6, %p490_p10 }
  0x52   : > { %p493_p8 = pnand %p492_p12, %p486_p0 }
  0x54   : > { %496 = shalt.err (!%p493_p8)
}
  0x55   : > { %s541_s4 = smov 256   ;;  %s542_s7 = smov 16  }
  0x56   : > { %391 = dma.vmem_to_hbm [thread:$0]  (%p756_p11), %s693_s8, 1024, %s702_s19, %s268_s13, %s541_s4, %s541_s4, %s542_s7  }
  0x57 PF: > { %p402_p9 = scmp.ge.s32.totalorder %s535_s12, 2  ;;  %s297_s20 = sand.u32 1, %s523_s9  }
  0x58   : > { %p757_p13 = scmp.ne.s32.totalorder %s754_s22, 0  ;;  %s298_s14 = scalar_lea.sflag [#allocation4], %s297_s20 }
  0x5a   : > { %p398_p1 = pnand %p402_p9, %p757_p13 }
  0x5c   : > { %518 = dma.done.wait (!%p398_p1), %s298_s14, 1024  }
  0x5d   : > { %520 = vsyncadd (!%p398_p1), %s298_s14, 4294966272  ;;  %p15_p3 = scmp.ge.s32.totalorder %s583_s15, 6   ;;  %s758_s9 = smov %s527_s10 }
  0x5e   : > { %s759_s10 = smov %s531_s11  ;;  %s760_s11 = smov %s595_s18 }
  0x5f   : > { %s761_s12 = smov %s583_s15  ;;  %17 = sbr.rel (!%p15_p3) target bundleno = 5 (0x5), region = 76 }
  0x66   :  { %303 = vsyncpa [#allocation3], 1 }
  0x67   :  { %305 = vsyncpa [#allocation3 + $0x1], 1 }
  0x68   :  { %306 = vsyncpa [#allocation4], 1 }
  0x69   :  { %308 = vsyncpa [#allocation4 + $0x1], 1 }

</bundles_post_ra>
